<compile_context>
chip_gen: v7x
topology: tpu7x:2x2x1
jax: 0.10.0
libtpu: 0.0.40
codegen_flags: <defaults>
</compile_context>

<pallas_src>
import jax
import jax.numpy as jnp
from jax.experimental import pallas as pl
from jax.experimental.pallas import tpu as pltpu

# ------------------------- problem sizes (small, synthetic) -------------------------
B, C, H, W = 2, 32, 8, 8          # batch, channels, spatial
J = 21                            # hand joints (heatmap channels)
HW = H * W
N = B * H * W                     # flattened pixel count
D_ENC = 64                        # mano encoding dim
D_HID = 128                       # hidden dim of mano MLP
N_POSE, N_SHAPE = 48, 10          # MANO pose / shape parameter sizes
N_J3D = 21 * 3                    # flattened 3D joints
PACK = 128                        # lane-dense packing width

# packed-column layout of the fused "he" slab:
#   cols [0, J)      : heatmap logits          (hand_regHead heatmap 1x1 conv)
#   cols [J, J+C)    : encoding features, ReLU (hand_regHead encoding 1x1 conv)
#   cols [J+C, 128)  : zero pad
# packed-column layout of the mano output slab:
POSE_OFF, SHAPE_OFF, J3D_OFF = 0, N_POSE, N_POSE + N_SHAPE   # 0..47 | 48..57 | 58..120


def _vmem():
    return pl.BlockSpec(memory_space=pltpu.MemorySpace.VMEM)


# --------------------------------- fused kernel ---------------------------------
def fused_regressor_kernel(x_ref, w_he_ref, b_he_ref, w_pool_ref, b_pool_ref,
                           w1_ref, b1_ref, w_ps_ref, b_ps_ref, w_j_ref, b_j_ref,
                           u_ref, v_ref, mano_ref):
    # ---- hand_regHead: heatmap + encoding 1x1 convs as ONE lane-dense matmul ----
    x = x_ref[...]                                                     # (N, C)
    he = (jnp.dot(x, w_he_ref[...], preferred_element_type=jnp.float32)
          + b_he_ref[...])                                             # (N, 128)
    col = jax.lax.broadcasted_iota(jnp.int32, he.shape, 1)
    is_enc = (col >= J) & (col < J + C)
    he = jnp.where(is_enc, jnp.maximum(he, 0.0), he)                   # ReLU on enc cols only

    he3 = he.reshape(B, HW, PACK)                                      # (B, HW, 128)

    # ---- spatial soft-argmax over the HW pixel axis ----
    # All 128 packed columns run in lockstep; only the first J (heatmap) columns
    # are meaningful / read back in the wrapper.
    m = jnp.max(he3, axis=1, keepdims=True)                            # (B, 1, 128)
    e = jnp.exp(he3 - m)
    denom = jnp.sum(e, axis=1, keepdims=True)                          # (B, 1, 128)
    p = e * pl.reciprocal(denom, approx=True)                          # softmax over pixels
    pix = jax.lax.broadcasted_iota(jnp.int32, (B, HW, PACK), 1).astype(jnp.float32)
    cv = jnp.floor(pix * (1.0 / W))                                    # row index  (y)
    cu = pix - cv * jnp.float32(W)                                     # col index  (x)
    u_ref[...] = jnp.sum(p * cu, axis=1)                               # (B, 128)
    v_ref[...] = jnp.sum(p * cv, axis=1)                               # (B, 128)

    # ---- hand_Encoder: global average pooling + fused FC + ReLU ----
    he_mean = jnp.sum(he3, axis=1) * jnp.float32(1.0 / HW)             # (B, 128)
    enc = jnp.maximum(
        jnp.dot(he_mean, w_pool_ref[...], preferred_element_type=jnp.float32)
        + b_pool_ref[...], 0.0)                                        # (B, D_ENC)

    # ---- mano_regHead: MLP -> packed pose|shape|joints slab ----
    h1 = jnp.maximum(
        jnp.dot(enc, w1_ref[...], preferred_element_type=jnp.float32) + b1_ref[...], 0.0)
    ps = (jnp.dot(h1, w_ps_ref[...], preferred_element_type=jnp.float32)
          + b_ps_ref[...])                                             # pose|shape in cols 0..57
    # TODO(synk): the real mano_regHead runs a MANO layer (needs external MANO model
    # files); replaced by a deterministic linear map (pose, shape) -> 3D joints
    # placed in cols 58..120 of the same packed slab.
    mano_ref[...] = ps + (jnp.dot(ps, w_j_ref[...],
                                  preferred_element_type=jnp.float32) + b_j_ref[...])


# ---------------------------------- parameter setup ----------------------------------
def init_params(key):
    ks = jax.random.split(key, 9)
    s = 0.05
    # raw (unpacked) weights, matching the torch heads
    w_hm = s * jax.random.normal(ks[0], (C, J), jnp.float32)
    w_enc = s * jax.random.normal(ks[1], (C, C), jnp.float32)
    w_pool_hm = s * jax.random.normal(ks[2], (J, D_ENC), jnp.float32)
    w_pool_enc = s * jax.random.normal(ks[3], (C, D_ENC), jnp.float32)
    w1 = s * jax.random.normal(ks[4], (D_ENC, D_HID), jnp.float32)
    wp = s * jax.random.normal(ks[5], (D_HID, N_POSE), jnp.float32)
    ws = s * jax.random.normal(ks[6], (D_HID, N_SHAPE), jnp.float32)
    wjp = s * jax.random.normal(ks[7], (N_POSE, N_J3D), jnp.float32)
    wjs = s * jax.random.normal(ks[8], (N_SHAPE, N_J3D), jnp.float32)

    # ---- pack into lane-dense fused weights (done once, outside the hot path) ----
    w_he = jnp.zeros((C, PACK), jnp.float32)
    w_he = w_he.at[:, :J].set(w_hm).at[:, J:J + C].set(w_enc)
    b_he = jnp.zeros((1, PACK), jnp.float32)

    w_pool = jnp.zeros((PACK, D_ENC), jnp.float32)
    w_pool = w_pool.at[:J, :].set(w_pool_hm).at[J:J + C, :].set(w_pool_enc)
    b_pool = jnp.zeros((1, D_ENC), jnp.float32)

    b1 = jnp.zeros((1, D_HID), jnp.float32)

    w_ps = jnp.zeros((D_HID, PACK), jnp.float32)
    w_ps = w_ps.at[:, POSE_OFF:POSE_OFF + N_POSE].set(wp)
    w_ps = w_ps.at[:, SHAPE_OFF:SHAPE_OFF + N_SHAPE].set(ws)
    b_ps = jnp.zeros((1, PACK), jnp.float32)

    w_j = jnp.zeros((PACK, PACK), jnp.float32)
    w_j = w_j.at[POSE_OFF:POSE_OFF + N_POSE, J3D_OFF:J3D_OFF + N_J3D].set(wjp)
    w_j = w_j.at[SHAPE_OFF:SHAPE_OFF + N_SHAPE, J3D_OFF:J3D_OFF + N_J3D].set(wjs)
    b_j = jnp.zeros((1, PACK), jnp.float32)

    return {"w_he": w_he, "b_he": b_he, "w_pool": w_pool, "b_pool": b_pool,
            "w1": w1, "b1": b1, "w_ps": w_ps, "b_ps": b_ps, "w_j": w_j, "b_j": b_j}


# ------------------------------------ forward glue ------------------------------------
@jax.jit
def regressor_forward(feats, params):
    """feats: (B, C, H, W) float32 (NCHW, like the PyTorch module)."""
    b, c, h, w = feats.shape
    n = b * h * w

    # NCHW -> (B*H*W, C) pixels-x-channels so the 1x1 convs are a single MXU matmul.
    x_flat = jnp.transpose(feats, (0, 2, 3, 1)).reshape(n, c)

    # One fused kernel: hand_regHead + soft-argmax + hand_Encoder + mano_regHead.
    # Heatmaps / encoding / mano_encoding never leave VMEM.
    u_full, v_full, mano_packed = pl.pallas_call(
        fused_regressor_kernel,
        out_shape=(jax.ShapeDtypeStruct((b, PACK), jnp.float32),   # u (x) per joint col
                   jax.ShapeDtypeStruct((b, PACK), jnp.float32),   # v (y) per joint col
                   jax.ShapeDtypeStruct((b, PACK), jnp.float32)),  # pose|shape|joints slab
        in_specs=[_vmem()] * 11,
        out_specs=(_vmem(), _vmem(), _vmem()),
    )(x_flat, params["w_he"], params["b_he"], params["w_pool"], params["b_pool"],
      params["w1"], params["b1"], params["w_ps"], params["b_ps"],
      params["w_j"], params["b_j"])

    preds_joints_img = jnp.stack([u_full[:, :J], v_full[:, :J]], axis=-1)   # (B, J, 2)
    pred_mano_results = {
        "mano_pose": mano_packed[:, POSE_OFF:POSE_OFF + N_POSE],            # (B, 48)
        "mano_shape": mano_packed[:, SHAPE_OFF:SHAPE_OFF + N_SHAPE],        # (B, 10)
        "joints3d": mano_packed[:, J3D_OFF:J3D_OFF + N_J3D].reshape(b, 21, 3),
    }
    return pred_mano_results, preds_joints_img


def regressor(feats, params, gt_mano_params=None):
    """Mirrors Regressor.forward: (pred_mano_results, gt_mano_results, preds_joints_img)."""
    pred_mano_results, preds_joints_img = regressor_forward(feats, params)
    gt_mano_results = None
    if gt_mano_params is not None:
        # TODO(synk): real code runs the GT params through the MANO layer (external
        # model files); here we just split them into pose / shape.
        gt_mano_results = {"mano_pose": gt_mano_params[:, :N_POSE],
                           "mano_shape": gt_mano_params[:, N_POSE:]}
    return pred_mano_results, gt_mano_results, preds_joints_img


# ----------------------------------------- main -----------------------------------------
if __name__ == "__main__":
    key = jax.random.PRNGKey(0)
    k_feat, k_param = jax.random.split(key)
    feats = jax.random.normal(k_feat, (B, C, H, W), jnp.float32)   # NCHW like PyTorch
    params = init_params(k_param)

    pred_mano_results, gt_mano_results, preds_joints_img = regressor(feats, params, None)

    jax.block_until_ready(pred_mano_results["joints3d"])
    jax.block_until_ready(preds_joints_img)

    assert pred_mano_results["mano_pose"].shape == (B, N_POSE)
    assert pred_mano_results["mano_shape"].shape == (B, N_SHAPE)
    assert pred_mano_results["joints3d"].shape == (B, 21, 3)
    assert preds_joints_img.shape == (B, J, 2)
    assert gt_mano_results is None
    assert bool(jnp.all(jnp.isfinite(preds_joints_img)))
    assert bool(jnp.all(jnp.isfinite(pred_mano_results["joints3d"])))

    print("KERNEL_OK")
</pallas_src>

<mosaic_0001>
module attributes {stable_mosaic.version = 11 : i64} {
  func.func @fused_regressor_kernel(%arg0: memref<128x32xf32, #tpu.memory_space<vmem>>, %arg1: memref<32x128xf32, #tpu.memory_space<vmem>>, %arg2: memref<1x128xf32, #tpu.memory_space<vmem>>, %arg3: memref<128x64xf32, #tpu.memory_space<vmem>>, %arg4: memref<1x64xf32, #tpu.memory_space<vmem>>, %arg5: memref<64x128xf32, #tpu.memory_space<vmem>>, %arg6: memref<1x128xf32, #tpu.memory_space<vmem>>, %arg7: memref<128x128xf32, #tpu.memory_space<vmem>>, %arg8: memref<1x128xf32, #tpu.memory_space<vmem>>, %arg9: memref<128x128xf32, #tpu.memory_space<vmem>>, %arg10: memref<1x128xf32, #tpu.memory_space<vmem>>, %arg11: memref<2x128xf32, #tpu.memory_space<vmem>>, %arg12: memref<2x128xf32, #tpu.memory_space<vmem>>, %arg13: memref<2x128xf32, #tpu.memory_space<vmem>>) attributes {dimension_semantics = [], scalar_prefetch = 0 : i64, scratch_operands = 0 : i64, tpu.core_type = #tpu.core_type<tc>} {
    %c0 = arith.constant 0 : index
    %c0_0 = arith.constant 0 : index
    %0 = vector.load %arg0[%c0, %c0_0] : memref<128x32xf32, #tpu.memory_space<vmem>>, vector<128x32xf32>
    %c0_1 = arith.constant 0 : index
    %c0_2 = arith.constant 0 : index
    %1 = vector.load %arg1[%c0_1, %c0_2] : memref<32x128xf32, #tpu.memory_space<vmem>>, vector<32x128xf32>
    %cst = arith.constant dense<0.000000e+00> : vector<128x128xf32>
    %2 = tpu.matmul %0, %1, %cst {dimension_numbers = #tpu.dot_dimension_numbers<[1], [0], [0], [1], [0, 0, 1, 1], [], []>} : vector<128x32xf32>, vector<32x128xf32>, vector<128x128xf32> -> vector<128x128xf32>
    %c0_3 = arith.constant 0 : index
    %c0_4 = arith.constant 0 : index
    %3 = vector.load %arg2[%c0_3, %c0_4] : memref<1x128xf32, #tpu.memory_space<vmem>>, vector<1x128xf32>
    %4 = vector.broadcast %3 : vector<1x128xf32> to vector<128x128xf32>
    %5 = arith.addf %2, %4 : vector<128x128xf32>
    %6 = tpu.iota {dimensions = array<i32: 1>} : vector<128x128xi32>
    %c21_i32 = arith.constant 21 : i32
    %7 = vector.broadcast %c21_i32 : i32 to vector<128x128xi32>
    %8 = arith.cmpi sge, %6, %7 : vector<128x128xi32>
    %c53_i32 = arith.constant 53 : i32
    %9 = vector.broadcast %c53_i32 : i32 to vector<128x128xi32>
    %10 = arith.cmpi slt, %6, %9 : vector<128x128xi32>
    %11 = arith.andi %8, %10 : vector<128x128xi1>
    %cst_5 = arith.constant 0.000000e+00 : f32
    %12 = vector.broadcast %cst_5 : f32 to vector<128x128xf32>
    %13 = arith.maximumf %5, %12 : vector<128x128xf32>
    %14 = arith.select %11, %13, %5 : vector<128x128xi1>, vector<128x128xf32>
    %15 = vector.shape_cast %14 : vector<128x128xf32> to vector<2x64x128xf32>
    %cst_6 = arith.constant dense<0xFF800000> : vector<2x128xf32>
    %16 = vector.multi_reduction <maximumf>, %15, %cst_6 [1] : vector<2x64x128xf32> to vector<2x128xf32>
    %17 = vector.shape_cast %16 : vector<2x128xf32> to vector<2x1x128xf32>
    %18 = vector.broadcast %17 : vector<2x1x128xf32> to vector<2x64x128xf32>
    %19 = arith.subf %15, %18 : vector<2x64x128xf32>
    %20 = math.exp %19 : vector<2x64x128xf32>
    %cst_7 = arith.constant dense<0.000000e+00> : vector<2x128xf32>
    %21 = vector.multi_reduction <add>, %20, %cst_7 [1] : vector<2x64x128xf32> to vector<2x128xf32>
    %22 = vector.shape_cast %21 : vector<2x128xf32> to vector<2x1x128xf32>
    %23 = tpu.reciprocal %22 {approx = true} : vector<2x1x128xf32> -> vector<2x1x128xf32>
    %24 = vector.broadcast %23 : vector<2x1x128xf32> to vector<2x64x128xf32>
    %25 = arith.mulf %20, %24 : vector<2x64x128xf32>
    %26 = tpu.iota {dimensions = array<i32: 1>} : vector<2x64x128xi32>
    %27 = arith.sitofp %26 : vector<2x64x128xi32> to vector<2x64x128xf32>
    %cst_8 = arith.constant 1.250000e-01 : f32
    %28 = vector.broadcast %cst_8 : f32 to vector<2x64x128xf32>
    %29 = arith.mulf %27, %28 : vector<2x64x128xf32>
    %30 = math.floor %29 : vector<2x64x128xf32>
    %cst_9 = arith.constant 8.000000e+00 : f32
    %31 = vector.broadcast %cst_9 : f32 to vector<2x64x128xf32>
    %32 = arith.mulf %30, %31 : vector<2x64x128xf32>
    %33 = arith.subf %27, %32 : vector<2x64x128xf32>
    %34 = arith.mulf %25, %33 : vector<2x64x128xf32>
    %cst_10 = arith.constant dense<0.000000e+00> : vector<2x128xf32>
    %35 = vector.multi_reduction <add>, %34, %cst_10 [1] : vector<2x64x128xf32> to vector<2x128xf32>
    %c0_11 = arith.constant 0 : index
    %c0_12 = arith.constant 0 : index
    %36 = vector.load %arg11[%c0_11, %c0_12] : memref<2x128xf32, #tpu.memory_space<vmem>>, vector<2x128xf32>
    tpu.vector_store %arg11[%c0_11, %c0_12], %35 {strides = array<i32>} : memref<2x128xf32, #tpu.memory_space<vmem>>, vector<2x128xf32>,
    %37 = arith.mulf %25, %30 : vector<2x64x128xf32>
    %cst_13 = arith.constant dense<0.000000e+00> : vector<2x128xf32>
    %38 = vector.multi_reduction <add>, %37, %cst_13 [1] : vector<2x64x128xf32> to vector<2x128xf32>
    %c0_14 = arith.constant 0 : index
    %c0_15 = arith.constant 0 : index
    %39 = vector.load %arg12[%c0_14, %c0_15] : memref<2x128xf32, #tpu.memory_space<vmem>>, vector<2x128xf32>
    tpu.vector_store %arg12[%c0_14, %c0_15], %38 {strides = array<i32>} : memref<2x128xf32, #tpu.memory_space<vmem>>, vector<2x128xf32>,
    %cst_16 = arith.constant dense<0.000000e+00> : vector<2x128xf32>
    %40 = vector.multi_reduction <add>, %15, %cst_16 [1] : vector<2x64x128xf32> to vector<2x128xf32>
    %cst_17 = arith.constant 1.562500e-02 : f32
    %41 = vector.broadcast %cst_17 : f32 to vector<2x128xf32>
    %42 = arith.mulf %40, %41 : vector<2x128xf32>
    %c0_18 = arith.constant 0 : index
    %c0_19 = arith.constant 0 : index
    %43 = vector.load %arg3[%c0_18, %c0_19] : memref<128x64xf32, #tpu.memory_space<vmem>>, vector<128x64xf32>
    %cst_20 = arith.constant dense<0.000000e+00> : vector<2x64xf32>
    %44 = tpu.matmul %42, %43, %cst_20 {dimension_numbers = #tpu.dot_dimension_numbers<[1], [0], [0], [1], [0, 0, 1, 1], [], []>} : vector<2x128xf32>, vector<128x64xf32>, vector<2x64xf32> -> vector<2x64xf32>
    %c0_21 = arith.constant 0 : index
    %c0_22 = arith.constant 0 : index
    %45 = vector.load %arg4[%c0_21, %c0_22] : memref<1x64xf32, #tpu.memory_space<vmem>>, vector<1x64xf32>
    %46 = vector.broadcast %45 : vector<1x64xf32> to vector<2x64xf32>
    %47 = arith.addf %44, %46 : vector<2x64xf32>
    %cst_23 = arith.constant 0.000000e+00 : f32
    %48 = vector.broadcast %cst_23 : f32 to vector<2x64xf32>
    %49 = arith.maximumf %47, %48 : vector<2x64xf32>
    %c0_24 = arith.constant 0 : index
    %c0_25 = arith.constant 0 : index
    %50 = vector.load %arg5[%c0_24, %c0_25] : memref<64x128xf32, #tpu.memory_space<vmem>>, vector<64x128xf32>
    %cst_26 = arith.constant dense<0.000000e+00> : vector<2x128xf32>
    %51 = tpu.matmul %49, %50, %cst_26 {dimension_numbers = #tpu.dot_dimension_numbers<[1], [0], [0], [1], [0, 0, 1, 1], [], []>} : vector<2x64xf32>, vector<64x128xf32>, vector<2x128xf32> -> vector<2x128xf32>
    %c0_27 = arith.constant 0 : index
    %c0_28 = arith.constant 0 : index
    %52 = vector.load %arg6[%c0_27, %c0_28] : memref<1x128xf32, #tpu.memory_space<vmem>>, vector<1x128xf32>
    %53 = vector.broadcast %52 : vector<1x128xf32> to vector<2x128xf32>
    %54 = arith.addf %51, %53 : vector<2x128xf32>
    %cst_29 = arith.constant 0.000000e+00 : f32
    %55 = vector.broadcast %cst_29 : f32 to vector<2x128xf32>
    %56 = arith.maximumf %54, %55 : vector<2x128xf32>
    %c0_30 = arith.constant 0 : index
    %c0_31 = arith.constant 0 : index
    %57 = vector.load %arg7[%c0_30, %c0_31] : memref<128x128xf32, #tpu.memory_space<vmem>>, vector<128x128xf32>
    %cst_32 = arith.constant dense<0.000000e+00> : vector<2x128xf32>
    %58 = tpu.matmul %56, %57, %cst_32 {dimension_numbers = #tpu.dot_dimension_numbers<[1], [0], [0], [1], [0, 0, 1, 1], [], []>} : vector<2x128xf32>, vector<128x128xf32>, vector<2x128xf32> -> vector<2x128xf32>
    %c0_33 = arith.constant 0 : index
    %c0_34 = arith.constant 0 : index
    %59 = vector.load %arg8[%c0_33, %c0_34] : memref<1x128xf32, #tpu.memory_space<vmem>>, vector<1x128xf32>
    %60 = vector.broadcast %59 : vector<1x128xf32> to vector<2x128xf32>
    %61 = arith.addf %58, %60 : vector<2x128xf32>
    %c0_35 = arith.constant 0 : index
    %c0_36 = arith.constant 0 : index
    %62 = vector.load %arg9[%c0_35, %c0_36] : memref<128x128xf32, #tpu.memory_space<vmem>>, vector<128x128xf32>
    %cst_37 = arith.constant dense<0.000000e+00> : vector<2x128xf32>
    %63 = tpu.matmul %61, %62, %cst_37 {dimension_numbers = #tpu.dot_dimension_numbers<[1], [0], [0], [1], [0, 0, 1, 1], [], []>} : vector<2x128xf32>, vector<128x128xf32>, vector<2x128xf32> -> vector<2x128xf32>
    %c0_38 = arith.constant 0 : index
    %c0_39 = arith.constant 0 : index
    %64 = vector.load %arg10[%c0_38, %c0_39] : memref<1x128xf32, #tpu.memory_space<vmem>>, vector<1x128xf32>
    %65 = vector.broadcast %64 : vector<1x128xf32> to vector<2x128xf32>
    %66 = arith.addf %63, %65 : vector<2x128xf32>
    %67 = arith.addf %61, %66 : vector<2x128xf32>
    %c0_40 = arith.constant 0 : index
    %c0_41 = arith.constant 0 : index
    %68 = vector.load %arg13[%c0_40, %c0_41] : memref<2x128xf32, #tpu.memory_space<vmem>>, vector<2x128xf32>
    tpu.vector_store %arg13[%c0_40, %c0_41], %67 {strides = array<i32>} : memref<2x128xf32, #tpu.memory_space<vmem>>, vector<2x128xf32>,
    return
  }
}

</mosaic_0001>

<bundles_post_ra>
// kernel: regressor_forward.1
= control target key start
LH: loop header
LB: loop body
LE: loop exit
PB: predicated region body
PF: predicated region fallthrough
CT: control target
= control target key end

     0   :  { %19 = vsyncpa [#allocation3], 0  ;;  %s2089_s0 = inlined_call_operand.vmem [shape: f32[128,32], index: 0, kind: input, shape index: {}]   ;;  %s2090_s1 = inlined_call_operand.hbm [shape: f32[32,128], index: 1, kind: input, shape index: {}]   ;;  %s2091_s2 = inlined_call_operand.vmem [shape: f32[1,128], index: 2, kind: input, shape index: {}]   ;;  %s2092_s3 = inlined_call_operand.vmem [shape: f32[128,64], index: 3, kind: input, shape index: {}]   ;;  %s2093_s4 = inlined_call_operand.vmem [shape: f32[1,64], index: 4, kind: input, shape index: {}]   ;;  %s2094_s5 = inlined_call_operand.vmem [shape: f32[64,128], index: 5, kind: input, shape index: {}]   ;;  %s2095_s6 = inlined_call_operand.vmem [shape: f32[1,128], index: 6, kind: input, shape index: {}]   ;;  %s2096_s7 = inlined_call_operand.hbm [shape: f32[128,128], index: 7, kind: input, shape index: {}]   ;;  %s2097_s8 = inlined_call_operand.vmem [shape: f32[1,128], index: 8, kind: input, shape index: {}]   ;;  %s2098_s9 = inlined_call_operand.hbm [shape: f32[128,128], index: 9, kind: input, shape index: {}]   ;;  %s2099_s10 = inlined_call_operand.vmem [shape: f32[1,128], index: 10, kind: input, shape index: {}]   ;;  %s2100_s11 = inlined_call_operand.vmem [shape: f32[2,128], index: 11, kind: output, shape index: {0}]   ;;  %s2101_s12 = inlined_call_operand.vmem [shape: f32[2,128], index: 12, kind: output, shape index: {1}]   ;;  %s2102_s13 = inlined_call_operand.vmem [shape: f32[2,128], index: 13, kind: output, shape index: {2}]  }
   0x1   :  { %20 = vsyncpa [#allocation5], 0  ;;  %s1484_s25 = smov [#allocation4]   ;;  %s1485_s27 = smov [#allocation2]  }
   0x2   :  { %s50_s26 = sshll.u32 %s1484_s25, 4  ;;  %s28_s28 = sshll.u32 %s1485_s27, 4  ;;  %s51_s26 = int_to_ptr.vmem [resolvable:$true] %s50_s26  ;;  %s1562_s28 = int_to_ptr.vmem [resolvable:$true] %s28_s28 }
   0x3   :  { %s1414_s14 = scalar_lea.hbm %s2096_s7, 2048 }
   0x4   :  { %p1415_p0 = scmp.ne.s32.totalorder %s2096_s7, %s1414_s14  ;;  %p1418_p1 = scmp.lt.u32.totalorder %s1414_s14, %s2096_s7 }
   0x6   :  { %p1420_p2 = pnand %p1418_p1, %p1415_p0 }
   0x8   :  { %1423 = shalt.err (!%p1420_p2)
}
   0x9   :  { %s1424_s19 = scalar_lea.vmem %s51_s26, 2048  ;;  %p1429_p4 = scmp.lt.s32.totalorder %s51_s26, %s51_s26 }
   0xa   :  { %p1425_p3 = scmp.ne.s32.totalorder %s51_s26, %s1424_s19  ;;  %p1430_p5 = scmp.lt.s32.totalorder %s1424_s19, %s1424_s19 }
   0xc   :  { %p1431_p6 = por %p1430_p5, %p1429_p4 }
   0xe   :  { %p1432_p7 = pnand %p1431_p6, %p1425_p3 }
  0x10   :  { %1435 = shalt.err (!%p1432_p7)
}
  0x11   :  { %s1486_s20 = smov 128   ;;  %s1487_s21 = smov 8  }
  0x12   :  { %56 = dma.hbm_to_vmem [thread:$0]  %s2096_s7, 2048, %s51_s26, [#allocation5], %s1486_s20, %s1486_s20, %s1487_s21  }
  0x13   :  { %s1436_s27 = scalar_lea.hbm %s2090_s1, 512 }
  0x14   :  { %p1437_p8 = scmp.ne.s32.totalorder %s2090_s1, %s1436_s27  ;;  %p1440_p9 = scmp.lt.u32.totalorder %s1436_s27, %s2090_s1 }
  0x16   :  { %p1442_p10 = pnand %p1440_p9, %p1437_p8 }
  0x18   :  { %1445 = shalt.err (!%p1442_p10)
}
  0x19   :  { %s1446_s16 = scalar_lea.vmem %s1562_s28, 512  ;;  %p1451_p12 = scmp.lt.s32.totalorder %s1562_s28, %s1562_s28 }
  0x1a   :  { %p1447_p11 = scmp.ne.s32.totalorder %s1562_s28, %s1446_s16  ;;  %p1452_p13 = scmp.lt.s32.totalorder %s1446_s16, %s1446_s16 }
  0x1c   :  { %p1453_p0 = por %p1452_p13, %p1451_p12 }
  0x1e   :  { %p1454_p1 = pnand %p1453_p0, %p1447_p11 }
  0x20   :  { %1457 = shalt.err (!%p1454_p1)
}
  0x21   :  { %34 = dma.hbm_to_vmem [thread:$0]  %s2090_s1, 512, %s1562_s28, [#allocation3], %s1486_s20, %s1486_s20, %s1487_s21  }
  0x22   :  { %s1488_s17 = smov [#allocation6]   ;;  %s1458_s23 = scalar_lea.hbm %s2098_s9, 2048 }
  0x23   :  { %s64_s18 = sshll.u32 %s1488_s17, 4  ;;  %p1459_p2 = scmp.ne.s32.totalorder %s2098_s9, %s1458_s23  ;;  %s65_s18 = int_to_ptr.vmem [resolvable:$true] %s64_s18 }
  0x24   :  { %p1462_p3 = scmp.lt.u32.totalorder %s1458_s23, %s2098_s9 }
  0x26   :  { %p1464_p4 = pnand %p1462_p3, %p1459_p2 }
  0x28   :  { %1467 = shalt.err (!%p1464_p4)
}
  0x29   :  { %s1468_s30 = scalar_lea.vmem %s65_s18, 2048  ;;  %p1473_p6 = scmp.lt.s32.totalorder %s65_s18, %s65_s18 }
  0x2a   :  { %p1469_p5 = scmp.ne.s32.totalorder %s65_s18, %s1468_s30  ;;  %p1474_p7 = scmp.lt.s32.totalorder %s1468_s30, %s1468_s30 }
  0x2c   :  { %p1475_p8 = por %p1474_p7, %p1473_p6 }
  0x2e   :  { %p1476_p9 = pnand %p1475_p8, %p1469_p5 }
  0x30   :  { %1479 = shalt.err (!%p1476_p9)
}
  0x31   :  { %70 = dma.hbm_to_vmem [thread:$0]  %s2098_s9, 2048, %s65_s18, [#allocation5], %s1486_s20, %s1486_s20, %s1487_s21  }
  0x32   :  { %1480 = dma.done.wait [#allocation3], 512  }
  0x33   :  { %1481 = vsyncadd [#allocation3], 4294966784 }
  0x34   :  { %1482 = dma.done.wait [#allocation5], 4096  }
  0x35   :  { %1483 = vsyncadd [#allocation5], 4294963200  ;;  %vm109_vm0 = vcmask 261120   ;;  %v98_v0 = vld [vmem:[#allocation2] sm:$0xff]  ;;  %v99_v1 = vld [vmem:[#allocation2 + $0x8] sm:$0xff]  ;;  %v1489_v25 = vmov 0.0|0.0   ;;  %v303_v48 = vlaneseq }
  0x36   :  { %v100_v2 = vld [vmem:[#allocation2 + $0x10] sm:$0xff]  ;;  %v1278_v3 = vpack.c.bf16 %v99_v1, %v98_v0  ;;  %v101_v4 = vld [vmem:[#allocation2 + $0x18] sm:$0xff]  ;;  %v82_v5 = vld [vmem:[%s2089_s0] sm:$0xff]  ;;  %1286 = vmatprep.subr.bf16.mxu1 %v1489_v25  ;;  %vm1490_vm1 = vmmov 0   ;;  %v1491_v47 = vmov 0.0   ;;  %vm551_vm5 = vcmask 1041409  }
  0x37   :  { %v1282_v6 = vpack.c.bf16 %v101_v4, %v100_v2  ;;  %1130 = vmatprep.mubr.msk.f32.mxu0 %vm109_vm0, %v82_v5  ;;  %v83_v7 = vld [vmem:[%s2089_s0 + $0x8] sm:$0xff]  ;;  %v84_v8 = vld [vmem:[%s2089_s0 + $0x10] sm:$0xff]  ;;  %v85_v9 = vld [vmem:[%s2089_s0 + $0x18] sm:$0xff]  ;;  %1186 = vmatprep.mubr.msk.f32.mxu1 %vm1490_vm1, %v1491_v47  ;;  %v304_v49 = vand.u32 127, %v303_v48  ;;  %vm743_vm6 = vcmask 523264  }
  0x38   :  { %1279 = vmatprep.subr.bf16.mxu0 %v1278_v3  ;;  %v86_v10 = vld [vmem:[%s2089_s0 + $0x20] sm:$0xff]  ;;  %v87_v11 = vld [vmem:[%s2089_s0 + $0x28] sm:$0xff]  ;;  %v88_v12 = vld [vmem:[%s2089_s0 + $0x30] sm:$0xff] }
  0x39   :  { %1281 = vmatpush3.bf16.msra.mxu0 %v1278_v3  ;;  %v89_v13 = vld [vmem:[%s2089_s0 + $0x38] sm:$0xff]  ;;  %v90_v14 = vld [vmem:[%s2089_s0 + $0x40] sm:$0xff]  ;;  %v91_v15 = vld [vmem:[%s2089_s0 + $0x48] sm:$0xff]  ;;  %vm305_vm2 = vcmp.ge.s32.totalorder %v304_v49, 21  ;;  %vm306_vm3 = vcmp.lt.s32.totalorder %v304_v49, 53 }
  0x3a   :  { %1283 = vmatprep.subr.bf16.mxu0 %v1282_v6  ;;  %v92_v16 = vld [vmem:[%s2089_s0 + $0x50] sm:$0xff]  ;;  %v93_v17 = vld [vmem:[%s2089_s0 + $0x58] sm:$0xff]  ;;  %v94_v18 = vld [vmem:[%s2089_s0 + $0x60] sm:$0xff] }
  0x3b   :  { %v95_v19 = vld [vmem:[%s2089_s0 + $0x68] sm:$0xff]  ;;  %v96_v20 = vld [vmem:[%s2089_s0 + $0x70] sm:$0xff]  ;;  %v97_v21 = vld [vmem:[%s2089_s0 + $0x78] sm:$0xff] }
  0x3c   :  { %v630_v22 = vld [vmem:[%s2092_s3] sm:$0xff]  ;;  %v631_v23 = vld [vmem:[%s2092_s3 + $0x8] sm:$0xff]  ;;  %v632_v26 = vld [vmem:[%s2092_s3 + $0x10] sm:$0xff] }
  0x3d   :  { %1285 = vmatpush3.bf16.msra.mxu0 %v1282_v6  ;;  %v1287_v24 = vpack.c.bf16 %v631_v23, %v630_v22  ;;  %v633_v27 = vld [vmem:[%s2092_s3 + $0x18] sm:$0xff]  ;;  %v634_v29 = vld [vmem:[%s2092_s3 + $0x20] sm:$0xff]  ;;  %v635_v30 = vld [vmem:[%s2092_s3 + $0x28] sm:$0xff] }
  0x3e   :  { %1310 = vmatprep.subr.bf16.mxu0 %v1489_v25  ;;  %v1290_v28 = vpack.c.bf16 %v633_v27, %v632_v26  ;;  %v1293_v31 = vpack.c.bf16 %v635_v30, %v634_v29  ;;  %v636_v32 = vld [vmem:[%s2092_s3 + $0x30] sm:$0xff]  ;;  %v637_v33 = vld [vmem:[%s2092_s3 + $0x38] sm:$0xff]  ;;  %v638_v35 = vld [vmem:[%s2092_s3 + $0x40] sm:$0xff] }
  0x3f   :  { %1288 = vmatpush3.bf16.msra.mxu1 %v1287_v24  ;;  %v1296_v34 = vpack.c.bf16 %v637_v33, %v636_v32  ;;  %v639_v36 = vld [vmem:[%s2092_s3 + $0x48] sm:$0xff]  ;;  %v640_v38 = vld [vmem:[%s2092_s3 + $0x50] sm:$0xff]  ;;  %v641_v39 = vld [vmem:[%s2092_s3 + $0x58] sm:$0xff] }
  0x40   :  { %1131 = vmatmul.mubr.msk.f32.vlgmr.msra.gmra.mrb[0].mxu0 %vm109_vm0, %v83_v7  ;;  %1289 = vmatprep.subr.bf16.mxu1 %v1489_v25  ;;  %v1299_v37 = vpack.c.bf16 %v639_v36, %v638_v35  ;;  %v1302_v40 = vpack.c.bf16 %v641_v39, %v640_v38  ;;  %v642_v41 = vld [vmem:[%s2092_s3 + $0x60] sm:$0xff]  ;;  %v643_v42 = vld [vmem:[%s2092_s3 + $0x68] sm:$0xff]  ;;  %v644_v44 = vld [vmem:[%s2092_s3 + $0x70] sm:$0xff] }
  0x41   :  { %1133 = vmatprep.mubr.msk.f32.mxu0 %vm109_vm0, %v84_v8  ;;  %v1305_v43 = vpack.c.bf16 %v643_v42, %v642_v41  ;;  %v645_v45 = vld [vmem:[%s2092_s3 + $0x78] sm:$0xff]  ;;  %v1744_v50 = vld [vmem:[%s2091_s2] ss:$0 sm:$0xff]  ;;  %vm1747_vm4 = vmand %vm305_vm2, %vm306_vm3 }
  0x42   :  { %v1308_v46 = vpack.c.bf16 %v645_v45, %v644_v44  ;;  %v731_v23 = vld [vmem:[%s2094_s5 + $0x18] sm:$0xff]  ;;  %v733_v35 = vld [vmem:[%s2094_s5 + $0x28] sm:$0xff] }
  0x43   :  { %1291 = vmatpush3.bf16.msra.mxu1 %v1290_v28 }
  0x44   :  { %1134 = vmatmul.mubr.msk.f32.gmra.mrb[2].mxu0 %vm109_vm0, %v85_v9  ;;  %1292 = vmatprep.subr.bf16.mxu1 %v1489_v25 }
  0x45   :  { %1136 = vmatprep.mubr.msk.f32.mxu0 %vm109_vm0, %v86_v10 }
  0x47   :  { %1294 = vmatpush3.bf16.msra.mxu1 %v1293_v31 }
  0x48   :  { %1137 = vmatmul.mubr.msk.f32.gmra.mrb[4].mxu0 %vm109_vm0, %v87_v11  ;;  %1295 = vmatprep.subr.bf16.mxu1 %v1489_v25 }
  0x49   :  { %1139 = vmatprep.mubr.msk.f32.mxu0 %vm109_vm0, %v88_v12 }
  0x4b   :  { %1297 = vmatpush3.bf16.msra.mxu1 %v1296_v34  ;;  %v732_v34 = vld [vmem:[%s2094_s5 + $0x20] sm:$0xff] }
  0x4c   :  { %1140 = vmatmul.mubr.msk.f32.gmra.mrb[6].mxu0 %vm109_vm0, %v89_v13  ;;  %1298 = vmatprep.subr.bf16.mxu1 %v1489_v25 }
  0x4d   :  { %1142 = vmatprep.mubr.msk.f32.mxu0 %vm109_vm0, %v90_v14 }
  0x4f   :  { %1300 = vmatpush3.bf16.msra.mxu1 %v1299_v37 }
  0x50   :  { %1143 = vmatmul.mubr.msk.f32.gmra.mrb[8].mxu0 %vm109_vm0, %v91_v15  ;;  %1301 = vmatprep.subr.bf16.mxu1 %v1489_v25  ;;  %v728_v15 = vld [vmem:[%s2094_s5] sm:$0xff] }
  0x51   :  { %1145 = vmatprep.mubr.msk.f32.mxu0 %vm109_vm0, %v92_v16  ;;  %v729_v16 = vld [vmem:[%s2094_s5 + $0x8] sm:$0xff] }
  0x52   :  { %v1311_v22 = vpack.c.bf16 %v729_v16, %v728_v15 }
  0x53   :  { %1303 = vmatpush3.bf16.msra.mxu1 %v1302_v40 }
  0x54   :  { %1146 = vmatmul.mubr.msk.f32.gmra.mrb[10].mxu0 %vm109_vm0, %v93_v17  ;;  %1304 = vmatprep.subr.bf16.mxu1 %v1489_v25  ;;  %v730_v17 = vld [vmem:[%s2094_s5 + $0x10] sm:$0xff] }
  0x55   :  { %1148 = vmatprep.mubr.msk.f32.mxu0 %vm109_vm0, %v94_v18  ;;  %1312 = vmatpush3.bf16.msra.mxu0 %v1311_v22  ;;  %v1314_v31 = vpack.c.bf16 %v731_v23, %v730_v17 }
  0x56   :  { %1313 = vmatprep.subr.bf16.mxu0 %v1489_v25 }
  0x57   :  { %1306 = vmatpush3.bf16.msra.mxu1 %v1305_v43 }
  0x58   :  { %1149 = vmatmul.mubr.msk.f32.gmra.mrb[12].mxu0 %vm109_vm0, %v95_v19  ;;  %1307 = vmatprep.subr.bf16.mxu1 %v1489_v25 }
  0x59   :  { %1151 = vmatprep.mubr.msk.f32.mxu0 %vm109_vm0, %v96_v20  ;;  %1315 = vmatpush3.bf16.msra.mxu0 %v1314_v31 }
  0x5a   :  { %1316 = vmatprep.subr.bf16.mxu0 %v1489_v25 }
  0x5b   :  { %1309 = vmatpush3.bf16.msra.mxu1 %v1308_v46  ;;  %v1317_v46 = vpack.c.bf16 %v733_v35, %v732_v34 }
  0x5c   :  { %1152 = vmatmul.mubr.msk.f32.gmra.mrb[14].mxu0 %vm109_vm0, %v97_v21  ;;  %1322 = vmatprep.subr.bf16.mxu1 %v1489_v25 }
  0x5d   :  { %1205 = vmatprep.mubr.msk.f32.mxu0 %vm1490_vm1, %v1491_v47  ;;  %1318 = vmatpush3.bf16.msra.mxu0 %v1317_v46 }
  0x5e   :  { %1319 = vmatprep.subr.bf16.mxu0 %v1489_v25 }
 0x113   :  { %v1132_v51 = vpop.f32.mrb[0].mxu0 }
 0x114   :  { %v230_v52 = vadd.f32 %v1132_v51, %v1744_v50  ;;  %v224_v53 = vpop.f32.mrb[1].mxu0 }
 0x115   :  { %v225_v55 = vadd.f32 %v1744_v50, %v224_v53  ;;  %v735_v53 = vld [vmem:[%s2094_s5 + $0x38] sm:$0xff] }
 0x116   :  { %v309_v56 = vmax.f32 %v230_v52, 0.0 }
 0x117   :  { %v308_v57 = vmax.f32 %v225_v55, 0.0  ;;  %v1135_v58 = vpop.f32.mrb[2].mxu0 }
 0x118   :  { %v1754_v59 = vsel %vm1747_vm4, %v309_v56, %v230_v52  ;;  %v240_v60 = vadd.f32 %v1135_v58, %v1744_v50  ;;  %v234_v61 = vpop.f32.mrb[3].mxu0  ;;  %v734_v52 = vld [vmem:[%s2094_s5 + $0x30] sm:$0xff] }
 0x119   :  { %v1759_v62 = vsel %vm1747_vm4, %v308_v57, %v225_v55  ;;  %v235_v63 = vadd.f32 %v1744_v50, %v234_v61 }
 0x11a   :  { %v602_v0 = vadd.f32 %v1754_v59, %v1759_v62  ;;  %v311_v1 = vmax.f32 %v240_v60, 0.0 }
 0x11b   :  { %v310_v2 = vmax.f32 %v235_v63, 0.0  ;;  %v1138_v3 = vpop.f32.mrb[4].mxu0 }
 0x11c   :  { %v1766_v4 = vsel %vm1747_vm4, %v311_v1, %v240_v60  ;;  %v250_v5 = vadd.f32 %v1138_v3, %v1744_v50  ;;  %v244_v6 = vpop.f32.mrb[5].mxu0  ;;  %v1320_v3 = vpack.c.bf16 %v735_v53, %v734_v52 }
 0x11d   :  { %v341_v7 = vmax.f32 %v1754_v59, %v1766_v4  ;;  %v1773_v8 = vsel %vm1747_vm4, %v310_v2, %v235_v63  ;;  %v245_v9 = vadd.f32 %v1744_v50, %v244_v6 }
 0x11e   :  { %v340_v10 = vmax.f32 %v1759_v62, %v1773_v8  ;;  %v603_v11 = vadd.f32 %v602_v0, %v1773_v8  ;;  %v313_v12 = vmax.f32 %v250_v5, 0.0  ;;  %1321 = vmatpush3.bf16.msra.mxu0 %v1320_v3 }
 0x11f   :  { %v312_v13 = vmax.f32 %v245_v9, 0.0  ;;  %v1141_v14 = vpop.f32.mrb[6].mxu0  ;;  %1346 = vmatprep.subr.bf16.mxu0 %v1489_v25 }
 0x120   :  { %v1790_v18 = vsel %vm1747_vm4, %v313_v12, %v250_v5  ;;  %v604_v19 = vadd.f32 %v603_v11, %v1766_v4  ;;  %v260_v20 = vadd.f32 %v1141_v14, %v1744_v50  ;;  %v254_v21 = vpop.f32.mrb[7].mxu0 }
 0x121   :  { %v343_v24 = vmax.f32 %v341_v7, %v1790_v18  ;;  %v1800_v26 = vsel %vm1747_vm4, %v312_v13, %v245_v9  ;;  %v255_v27 = vadd.f32 %v1744_v50, %v254_v21 }
 0x122   :  { %v342_v28 = vmax.f32 %v340_v10, %v1800_v26  ;;  %v605_v29 = vadd.f32 %v604_v19, %v1800_v26  ;;  %v315_v30 = vmax.f32 %v260_v20, 0.0 }
 0x123   :  { %v314_v32 = vmax.f32 %v255_v27, 0.0  ;;  %v1144_v33 = vpop.f32.mrb[8].mxu0 }
 0x124   :  { %v1814_v36 = vsel %vm1747_vm4, %v315_v30, %v260_v20  ;;  %v606_v37 = vadd.f32 %v605_v29, %v1790_v18  ;;  %v270_v38 = vadd.f32 %v1144_v33, %v1744_v50  ;;  %v264_v39 = vpop.f32.mrb[9].mxu0 }
 0x125   :  { %v345_v40 = vmax.f32 %v343_v24, %v1814_v36  ;;  %v1821_v41 = vsel %vm1747_vm4, %v314_v32, %v255_v27  ;;  %v265_v42 = vadd.f32 %v1744_v50, %v264_v39 }
 0x126   :  { %v344_v43 = vmax.f32 %v342_v28, %v1821_v41  ;;  %v607_v44 = vadd.f32 %v606_v37, %v1821_v41  ;;  %v317_v45 = vmax.f32 %v270_v38, 0.0 }
 0x127   :  { %v316_v49 = vmax.f32 %v265_v42, 0.0  ;;  %v1147_v51 = vpop.f32.mrb[10].mxu0 }
 0x128   :  { %v346_v55 = vmax.f32 %v344_v43, %v345_v40  ;;  %v608_v56 = vadd.f32 %v607_v44, %v1814_v36  ;;  %v1836_v57 = vsel %vm1747_vm4, %v317_v45, %v270_v38  ;;  %v280_v58 = vadd.f32 %v1147_v51, %v1744_v50  ;;  %v274_v60 = vpop.f32.mrb[11].mxu0 }
 0x129   :  { %v1841_v61 = vsel %vm1747_vm4, %v316_v49, %v265_v42  ;;  %v275_v63 = vadd.f32 %v1744_v50, %v274_v60 }
 0x12a   :  { %v347_v0 = vrot.slane %v346_v55, 4  ;;  %v615_v1 = vadd.f32 %v1836_v57, %v1841_v61  ;;  %v319_v2 = vmax.f32 %v280_v58, 0.0  ;;  %v609_v29 = vrot.slane %v608_v56, 4 }
 0x12b   :  { %v318_v5 = vmax.f32 %v275_v63, 0.0  ;;  %v1150_v6 = vpop.f32.mrb[12].mxu0 }
 0x12c   :  { %v348_v7 = vmax.f32 %v346_v55, %v347_v0  ;;  %v1849_v9 = vsel %vm1747_vm4, %v319_v2, %v280_v58  ;;  %v290_v10 = vadd.f32 %v1150_v6, %v1744_v50  ;;  %v284_v11 = vpop.f32.mrb[13].mxu0 }
 0x12d   :  { %v354_v12 = vmax.f32 %v1836_v57, %v1849_v9  ;;  %v1856_v13 = vsel %vm1747_vm4, %v318_v5, %v275_v63  ;;  %v285_v14 = vadd.f32 %v1744_v50, %v284_v11 }
 0x12e   :  { %v349_v15 = vrot.slane %v348_v7, 2  ;;  %v353_v16 = vmax.f32 %v1841_v61, %v1856_v13  ;;  %v616_v17 = vadd.f32 %v615_v1, %v1856_v13  ;;  %v321_v19 = vmax.f32 %v290_v10, 0.0 }
 0x12f   :  { %v320_v20 = vmax.f32 %v285_v14, 0.0  ;;  %v1153_v21 = vpop.f32.mrb[14].mxu0 }
 0x130   :  { %v350_v22 = vmax.f32 %v348_v7, %v349_v15  ;;  %v1865_v23 = vsel %vm1747_vm4, %v321_v19, %v290_v10  ;;  %v617_v24 = vadd.f32 %v616_v17, %v1849_v9  ;;  %v300_v27 = vadd.f32 %v1153_v21, %v1744_v50  ;;  %v294_v28 = vpop.f32.mrb[15].mxu0 }
 0x131   :  { %v356_v30 = vmax.f32 %v354_v12, %v1865_v23  ;;  %v1872_v31 = vsel %vm1747_vm4, %v320_v20, %v285_v14  ;;  %v295_v32 = vadd.f32 %v1744_v50, %v294_v28  ;;  %v610_v50 = vadd.f32 %v609_v29, %v608_v56 }
 0x132   :  { %v351_v33 = vrot.slane %v350_v22, 1  ;;  %v355_v34 = vmax.f32 %v353_v16, %v1872_v31  ;;  %v618_v35 = vadd.f32 %v617_v24, %v1872_v31  ;;  %v323_v37 = vmax.f32 %v300_v27, 0.0 }
 0x133   :  { %v322_v38 = vmax.f32 %v295_v32, 0.0 }
 0x134   :  { %v352_v39 = vmax.f32 %v350_v22, %v351_v33  ;;  %v1879_v40 = vsel %vm1747_vm4, %v323_v37, %v300_v27  ;;  %v619_v42 = vadd.f32 %v618_v35, %v1865_v23 }
 0x135   :  { %v358_v43 = vmax.f32 %v356_v30, %v1879_v40  ;;  %v1885_v44 = vsel %vm1747_vm4, %v322_v38, %v295_v32 }
 0x136   :  { %v366_v45 = vsub.f32 %v1759_v62, %v352_v39  ;;  %v367_v46 = vsub.f32 %v1754_v59, %v352_v39  ;;  %v368_v49 = vsub.f32 %v1773_v8, %v352_v39  ;;  %v369_v51 = vsub.f32 %v1766_v4, %v352_v39 }
 0x137   :  { %v370_v52 = vsub.f32 %v1800_v26, %v352_v39  ;;  %v371_v53 = vsub.f32 %v1790_v18, %v352_v39  ;;  %v372_v55 = vsub.f32 %v1821_v41, %v352_v39  ;;  %v373_v58 = vsub.f32 %v1814_v36, %v352_v39 }
 0x138   :  { %v382_v54 = vmul.f32 1.442695, %v366_v45  ;;  %v384_v60 = vmul.f32 1.442695, %v367_v46  ;;  %v357_v56 = vmax.f32 %v355_v34, %v1885_v44  ;;  %v386_v63 = vmul.f32 1.442695, %v368_v49 }
 0x139   :  { %v620_v62 = vadd.f32 %v619_v42, %v1885_v44  ;;  %v388_v8 = vmul.f32 1.442695, %v369_v51  ;;  %v611_v26 = vrot.slane %v610_v50, 2  ;;  %v390_v18 = vmul.f32 1.442695, %v370_v52 }
 0x13a   :  { %1378 = vpow2.f32 %v382_v54  ;;  %v359_v59 = vmax.f32 %v357_v56, %v358_v43  ;;  %v392_v36 = vmul.f32 1.442695, %v371_v53  ;;  %v394_v6 = vmul.f32 1.442695, %v372_v55 }
 0x13b   :  { %1380 = vpow2.f32 %v384_v60  ;;  %v621_v4 = vadd.f32 %v620_v62, %v1879_v40  ;;  %v612_v2 = vadd.f32 %v611_v26, %v610_v50  ;;  %v396_v11 = vmul.f32 1.442695, %v373_v58 }
 0x13c   :  { %v360_v0 = vrot.slane %v359_v59, 4  ;;  %1382 = vpow2.f32 %v386_v63  ;;  %v1931_v55 = vshrl.u32 %v303_v48, 7 }
 0x13d   :  { %v622_v41 = vrot.slane %v621_v4, 4  ;;  %1384 = vpow2.f32 %v388_v8  ;;  %v613_v12 = vrot.slane %v612_v2, 1 }
 0x13e   :  { %v361_v1 = vmax.f32 %v359_v59, %v360_v0  ;;  %1386 = vpow2.f32 %v390_v18  ;;  %v460_v63 = vadd.s32 8, %v1931_v55  ;;  %v1940_v8 = vadd.s32 16, %v1931_v55 }
 0x13f   :  { %v623_v3 = vadd.f32 %v622_v41, %v621_v4  ;;  %1388 = vpow2.f32 %v392_v36  ;;  %v614_v24 = vadd.f32 %v613_v12, %v612_v2  ;;  %v1947_v0 = vadd.s32 24, %v1931_v55 }
 0x140   :  { %v362_v5 = vrot.slane %v361_v1, 2  ;;  %1390 = vpow2.f32 %v394_v6  ;;  %v1952_v41 = vadd.s32 32, %v1931_v55  ;;  %v468_v36 = vcvt.s32.f32 %v460_v63 }
 0x141   :  { %v624_v7 = vrot.slane %v623_v3, 2  ;;  %1392 = vpow2.f32 %v396_v11  ;;  %v469_v6 = vcvt.s32.f32 %v1940_v8  ;;  %v1964_v12 = vadd.s32 48, %v1931_v55 }
 0x142   :  { %v363_v10 = vmax.f32 %v361_v1, %v362_v5  ;;  %v467_v1 = vcvt.s32.f32 %v1931_v55  ;;  %v1957_v5 = vadd.s32 40, %v1931_v55 }
 0x143   :  { %v625_v14 = vadd.f32 %v624_v7, %v623_v3 }
 0x144   :  { %v1898_v15 = vpop.eup %1378  ;;  %v364_v16 = vrot.slane %v363_v10, 1 }
 0x145   :  { %v1900_v17 = vpop.eup %1380  ;;  %v626_v19 = vrot.slane %v625_v14, 1 }
 0x146   :  { %v414_v20 = vadd.f32 %v1900_v17, %v1898_v15  ;;  %v365_v21 = vmax.f32 %v363_v10, %v364_v16  ;;  %v1904_v22 = vpop.eup %1382 }
 0x147   :  { %v627_v27 = vadd.f32 %v626_v19, %v625_v14  ;;  %v1910_v33 = vpop.eup %1384  ;;  %v1967_v14 = vadd.s32 56, %v1931_v55  ;;  %v470_v19 = vcvt.s32.f32 %v1947_v0 }
 0x148   :  { %v415_v28 = vadd.f32 %v1904_v22, %v414_v20  ;;  %v374_v29 = vsub.f32 %v1841_v61, %v365_v21  ;;  %v375_v30 = vsub.f32 %v1836_v57, %v365_v21  ;;  %v376_v32 = vsub.f32 %v1856_v13, %v365_v21  ;;  %v1918_v50 = vpop.eup %1386 }
 0x149   :  { %v377_v34 = vsub.f32 %v1849_v9, %v365_v21  ;;  %v378_v35 = vsub.f32 %v1872_v31, %v365_v21  ;;  %v379_v37 = vsub.f32 %v1865_v23, %v365_v21  ;;  %v380_v38 = vsub.f32 %v1885_v44, %v365_v21  ;;  %v1921_v9 = vpop.eup %1388 }
 0x14a   :  { %v416_v39 = vadd.f32 %v1910_v33, %v415_v28  ;;  %v381_v42 = vsub.f32 %v1879_v40, %v365_v21  ;;  %v398_v43 = vmul.f32 1.442695, %v374_v29  ;;  %v400_v61 = vmul.f32 1.442695, %v375_v30  ;;  %v1924_v46 = vpop.eup %1390 }
 0x14b   :  { %v402_v57 = vmul.f32 1.442695, %v376_v32  ;;  %v404_v31 = vmul.f32 1.442695, %v377_v34  ;;  %v628_v23 = vmul.f32 0.015625, %v614_v24  ;;  %v629_v45 = vmul.f32 0.015625, %v627_v27  ;;  %v1928_v52 = vpop.eup %1392 }
 0x14c   :  { %v417_v13 = vadd.f32 %v1918_v50, %v416_v39  ;;  %1394 = vpow2.f32 %v398_v43  ;;  %v406_v40 = vmul.f32 1.442695, %v378_v35  ;;  %v408_v53 = vmul.f32 1.442695, %v379_v37 }
 0x14d   :  { %1396 = vpow2.f32 %v400_v61  ;;  %v655_v49 = vsel %vm551_vm5, %v629_v45, %v628_v23  ;;  %v410_v54 = vmul.f32 1.442695, %v380_v38  ;;  %v412_v56 = vmul.f32 1.442695, %v381_v42 }
 0x14e   :  { %v418_v44 = vadd.f32 %v1921_v9, %v417_v13  ;;  %1398 = vpow2.f32 %v402_v57  ;;  %1187 = vmatmul.mubr.f32.vlgmr.msra.gmra.mrb[0].mxu1 %v655_v49  ;;  %v471_v20 = vcvt.s32.f32 %v1952_v41  ;;  %v475_v21 = vmul.f32 0.125, %v467_v1 }
 0x14f   :  { %1400 = vpow2.f32 %v404_v31  ;;  %1240 = vmatprep.mubr.msk.f32.mxu1 %vm1490_vm1, %v1491_v47  ;;  %v476_v24 = vmul.f32 0.125, %v468_v36  ;;  %v472_v29 = vcvt.s32.f32 %v1957_v5  ;;  %v477_v30 = vmul.f32 0.125, %v469_v6 }
 0x150   :  { %v419_v51 = vadd.f32 %v1924_v46, %v418_v44  ;;  %1402 = vpow2.f32 %v406_v40  ;;  %v473_v35 = vcvt.s32.f32 %v1964_v12  ;;  %v474_v38 = vcvt.s32.f32 %v1967_v14 }
 0x151   :  { %1404 = vpow2.f32 %v408_v53  ;;  %v478_v39 = vmul.f32 0.125, %v470_v19  ;;  %v1982_v42 = vfloor.f32 %v475_v21  ;;  %v1984_v43 = vfloor.f32 %v476_v24 }
 0x152   :  { %v420_v58 = vadd.f32 %v1928_v52, %v419_v51  ;;  %1406 = vpow2.f32 %v410_v54  ;;  %v479_v57 = vmul.f32 0.125, %v471_v20  ;;  %v480_v13 = vmul.f32 0.125, %v472_v29 }
 0x153   :  { %1408 = vpow2.f32 %v412_v56  ;;  %v1987_v31 = vfloor.f32 %v477_v30  ;;  %v481_v44 = vmul.f32 0.125, %v473_v35  ;;  %v482_v40 = vmul.f32 0.125, %v474_v38 }
 0x154   :  { %v421_v60 = vrot.slane %v420_v58, 4  ;;  %v1992_v49 = vfloor.f32 %v478_v39  ;;  %v491_v51 = vmul.f32 8.0, %v1982_v42  ;;  %v492_v53 = vmul.f32 8.0, %v1984_v43 }
 0x155   :  { %v1998_v54 = vfloor.f32 %v480_v13  ;;  %v2001_v63 = vfloor.f32 %v481_v44 }
 0x156   :  { %v1937_v62 = vpop.eup %1394  ;;  %v422_v59 = vadd.f32 %v421_v60, %v420_v58  ;;  %v1996_v58 = vfloor.f32 %v479_v57  ;;  %v493_v60 = vmul.f32 8.0, %v1987_v31  ;;  %v494_v8 = vmul.f32 8.0, %v1992_v49 }
 0x157   :  { %v1942_v48 = vpop.eup %1396 }
 0x158   :  { %v423_v4 = vrot.slane %v422_v59, 2  ;;  %v427_v26 = vadd.f32 %v1942_v48, %v1937_v62  ;;  %v1949_v18 = vpop.eup %1398  ;;  %v501_v5 = vsub.f32 %v469_v6, %v493_v60 }
 0x159   :  { %v1960_v7 = vpop.eup %1400 }
 0x15a   :  { %v424_v2 = vadd.f32 %v423_v4, %v422_v59  ;;  %v428_v3 = vadd.f32 %v1949_v18, %v427_v26  ;;  %v1969_v16 = vpop.eup %1402  ;;  %v2003_v59 = vfloor.f32 %v482_v40  ;;  %v2006_v4 = vsub.f32 %v467_v1, %v491_v51 }
 0x15b   :  { %v1975_v32 = vpop.eup %1404  ;;  %v2008_v26 = vsub.f32 %v468_v36, %v492_v53 }
 0x15c   :  { %v425_v10 = vrot.slane %v424_v2, 1  ;;  %v429_v11 = vadd.f32 %v1960_v7, %v428_v3  ;;  %v1979_v37 = vpop.eup %1406  ;;  %v496_v3 = vmul.f32 8.0, %v1998_v54 }
 0x15d   :  { %v1989_v23 = vpop.eup %1408 }
 0x15e   :  { %v426_v27 = vadd.f32 %v425_v10, %v424_v2  ;;  %v430_v28 = vadd.f32 %v1969_v16, %v429_v11  ;;  %v495_v2 = vmul.f32 8.0, %v1996_v58 }
 0x160   :  { %1410 = vrcp.f32 %v426_v27  ;;  %v431_v34 = vadd.f32 %v1975_v32, %v430_v28  ;;  %v502_v28 = vsub.f32 %v470_v19, %v494_v8 }
 0x162   :  { %v432_v61 = vadd.f32 %v1979_v37, %v431_v34 }
 0x164   :  { %v433_v45 = vadd.f32 %v1989_v23, %v432_v61  ;;  %v504_v61 = vsub.f32 %v472_v29, %v496_v3 }
 0x166   :  { %v434_v55 = vrot.slane %v433_v45, 4 }
 0x168   :  { %v435_v56 = vadd.f32 %v434_v55, %v433_v45 }
 0x16a   :  { %v1411_v0 = vpop.eup %1410  ;;  %v436_v41 = vrot.slane %v435_v56, 2 }
 0x16b   :  { %v448_v10 = vmul.f32 %v1411_v0, %v1924_v46  ;;  %v442_v11 = vmul.f32 %v1411_v0, %v1898_v15  ;;  %v443_v12 = vmul.f32 %v1411_v0, %v1900_v17  ;;  %v444_v14 = vmul.f32 %v1411_v0, %v1904_v22 }
 0x16c   :  { %v437_v21 = vadd.f32 %v436_v41, %v435_v56  ;;  %v445_v1 = vmul.f32 %v1411_v0, %v1910_v33  ;;  %v446_v36 = vmul.f32 %v1411_v0, %v1918_v50  ;;  %v447_v24 = vmul.f32 %v1411_v0, %v1921_v9 }
 0x16d   :  { %v449_v27 = vmul.f32 %v1411_v0, %v1928_v52  ;;  %v507_v6 = vmul.f32 %v2006_v4, %v442_v11  ;;  %v508_v46 = vmul.f32 %v2008_v26, %v443_v12  ;;  %v497_v15 = vmul.f32 8.0, %v2001_v63 }
 0x16e   :  { %v438_v30 = vrot.slane %v437_v21, 1  ;;  %v503_v17 = vsub.f32 %v471_v20, %v495_v2  ;;  %v509_v34 = vmul.f32 %v501_v5, %v444_v14  ;;  %v555_v39 = vmul.f32 %v1982_v42, %v442_v11 }
 0x16f   :  { %v523_v22 = vadd.f32 %v508_v46, %v507_v6  ;;  %v556_v50 = vmul.f32 %v1984_v43, %v443_v12  ;;  %v498_v9 = vmul.f32 8.0, %v2003_v59  ;;  %v510_v52 = vmul.f32 %v502_v28, %v445_v1 }
 0x170   :  { %v439_v33 = vadd.f32 %v438_v30, %v437_v21  ;;  %v557_v57 = vmul.f32 %v1987_v31, %v444_v14  ;;  %v505_v45 = vsub.f32 %v473_v35, %v497_v15  ;;  %v511_v44 = vmul.f32 %v503_v17, %v446_v36 }
 0x171   :  { %v524_v19 = vadd.f32 %v523_v22, %v509_v34  ;;  %v571_v13 = vadd.f32 %v556_v50, %v555_v39  ;;  %v558_v20 = vmul.f32 %v1992_v49, %v445_v1  ;;  %v506_v53 = vsub.f32 %v474_v38, %v498_v9 }
 0x172   :  { %1412 = vrcp.f32 %v439_v33  ;;  %v512_v55 = vmul.f32 %v504_v61, %v447_v24  ;;  %v559_v56 = vmul.f32 %v1996_v58, %v446_v36  ;;  %v513_v0 = vmul.f32 %v505_v45, %v448_v10 }
 0x173   :  { %v525_v40 = vadd.f32 %v524_v19, %v510_v52  ;;  %v572_v51 = vadd.f32 %v571_v13, %v557_v57  ;;  %v560_v41 = vmul.f32 %v1998_v54, %v447_v24  ;;  %v514_v3 = vmul.f32 %v506_v53, %v449_v27 }
 0x174   :  { %v561_v35 = vmul.f32 %v2001_v63, %v448_v10 }
 0x175   :  { %v526_v60 = vadd.f32 %v525_v40, %v511_v44  ;;  %v573_v8 = vadd.f32 %v572_v51, %v558_v20 }
 0x177   :  { %v527_v29 = vadd.f32 %v526_v60, %v512_v55  ;;  %v574_v2 = vadd.f32 %v573_v8, %v559_v56 }
 0x179   :  { %v528_v11 = vadd.f32 %v527_v29, %v513_v0  ;;  %v575_v12 = vadd.f32 %v574_v2, %v560_v41 }
 0x17b   :  { %v529_v14 = vadd.f32 %v528_v11, %v514_v3  ;;  %v576_v1 = vadd.f32 %v575_v12, %v561_v35 }
 0x17c   :  { %v1413_v21 = vpop.eup %1412 }
 0x17d   :  { %v456_v38 = vmul.f32 %v1413_v21, %v1979_v37  ;;  %v450_v6 = vmul.f32 %v1413_v21, %v1937_v62  ;;  %v451_v36 = vmul.f32 %v1413_v21, %v1942_v48  ;;  %v452_v46 = vmul.f32 %v1413_v21, %v1949_v18 }
 0x17e   :  { %v453_v30 = vmul.f32 %v1413_v21, %v1960_v7  ;;  %v454_v24 = vmul.f32 %v1413_v21, %v1969_v16  ;;  %v455_v15 = vmul.f32 %v1413_v21, %v1975_v32  ;;  %v457_v10 = vmul.f32 %v1413_v21, %v1989_v23 }
 0x17f   :  { %v515_v34 = vmul.f32 %v2006_v4, %v450_v6  ;;  %v516_v22 = vmul.f32 %v2008_v26, %v451_v36  ;;  %v517_v39 = vmul.f32 %v501_v5, %v452_v46  ;;  %v563_v62 = vmul.f32 %v1982_v42, %v450_v6 }
 0x180   :  { %v564_v48 = vmul.f32 %v1984_v43, %v451_v36  ;;  %v562_v18 = vmul.f32 %v2003_v59, %v449_v27  ;;  %v518_v33 = vmul.f32 %v502_v28, %v453_v30  ;;  %v565_v16 = vmul.f32 %v1987_v31, %v452_v46 }
 0x181   :  { %v536_v37 = vadd.f32 %v516_v22, %v515_v34  ;;  %v519_v9 = vmul.f32 %v503_v17, %v454_v24  ;;  %v530_v23 = vrot.slane %v529_v14, 4  ;;  %v566_v4 = vmul.f32 %v1992_v49, %v453_v30  ;;  %v818_v30 = vld [vmem:[#allocation4] sm:$0xff]  ;;  %v821_v34 = vld [vmem:[#allocation4 + $0x18] sm:$0xff] }
 0x182   :  { %v577_v50 = vadd.f32 %v576_v1, %v562_v18  ;;  %v584_v32 = vadd.f32 %v564_v48, %v563_v62  ;;  %v520_v5 = vmul.f32 %v504_v61, %v455_v15  ;;  %v567_v42 = vmul.f32 %v1996_v58, %v454_v24  ;;  %v819_v24 = vld [vmem:[#allocation4 + $0x8] sm:$0xff]  ;;  %v824_v48 = vld [vmem:[#allocation4 + $0x30] sm:$0xff]  ;;  %v825_v18 = vld [vmem:[#allocation4 + $0x38] sm:$0xff] }
 0x183   :  { %v537_v7 = vadd.f32 %v536_v37, %v517_v39  ;;  %v521_v13 = vmul.f32 %v505_v45, %v456_v38  ;;  %v531_v27 = vadd.f32 %v530_v23, %v529_v14  ;;  %v568_v44 = vmul.f32 %v1998_v54, %v455_v15  ;;  %v820_v15 = vld [vmem:[#allocation4 + $0x10] sm:$0xff]  ;;  %v822_v39 = vld [vmem:[#allocation4 + $0x20] sm:$0xff]  ;;  %v823_v37 = vld [vmem:[#allocation4 + $0x28] sm:$0xff] }
 0x184   :  { %v585_v26 = vadd.f32 %v584_v32, %v565_v16  ;;  %v578_v57 = vrot.slane %v577_v50, 4  ;;  %v522_v40 = vmul.f32 %v506_v53, %v457_v10  ;;  %v569_v17 = vmul.f32 %v2001_v63, %v456_v38  ;;  %v827_v16 = vld [vmem:[#allocation4 + $0x48] sm:$0xff]  ;;  %v828_v32 = vld [vmem:[#allocation4 + $0x50] sm:$0xff] }
 0x185   :  { %v538_v52 = vadd.f32 %v537_v7, %v518_v33  ;;  %v532_v49 = vrot.slane %v531_v27, 2  ;;  %v570_v61 = vmul.f32 %v2003_v59, %v457_v10  ;;  %v1323_v10 = vpack.c.bf16 %v819_v24, %v818_v30  ;;  %v826_v7 = vld [vmem:[#allocation4 + $0x40] sm:$0xff] }
 0x186   :  { %v586_v43 = vadd.f32 %v585_v26, %v566_v4  ;;  %v579_v51 = vadd.f32 %v578_v57, %v577_v50  ;;  %v1326_v22 = vpack.c.bf16 %v821_v34, %v820_v15  ;;  %v1329_v62 = vpack.c.bf16 %v823_v37, %v822_v39  ;;  %v831_v4 = vld [vmem:[#allocation4 + $0x68] sm:$0xff] }
 0x187   :  { %v539_v19 = vadd.f32 %v538_v52, %v519_v9  ;;  %v533_v45 = vadd.f32 %v532_v49, %v531_v27  ;;  %1324 = vmatpush3.bf16.msra.mxu1 %v1323_v10  ;;  %v1332_v33 = vpack.c.bf16 %v825_v18, %v824_v48  ;;  %v1335_v50 = vpack.c.bf16 %v827_v16, %v826_v7  ;;  %v829_v9 = vld [vmem:[#allocation4 + $0x58] sm:$0xff]  ;;  %v830_v52 = vld [vmem:[#allocation4 + $0x60] sm:$0xff]  ;;  %v916_v49 = vld [vmem:[#allocation6 + $0x28] sm:$0xff] }
 0x188   :  { %v587_v31 = vadd.f32 %v586_v43, %v567_v42  ;;  %v580_v8 = vrot.slane %v579_v51, 2  ;;  %1325 = vmatprep.subr.bf16.mxu1 %v1489_v25  ;;  %v1338_v23 = vpack.c.bf16 %v829_v9, %v828_v32  ;;  %v1341_v26 = vpack.c.bf16 %v831_v4, %v830_v52  ;;  %v833_v27 = vld [vmem:[#allocation4 + $0x78] sm:$0xff] }
 0x189   :  { %v540_v28 = vadd.f32 %v539_v19, %v520_v5  ;;  %v534_v53 = vrot.slane %v533_v45, 1  ;;  %v1037_v5 = vld [vmem:[%s2093_s4] ss:$0 sm:$0xff] }
 0x18a   :  { %v588_v55 = vadd.f32 %v587_v31, %v568_v44  ;;  %v581_v54 = vadd.f32 %v580_v8, %v579_v51  ;;  %v911_v44 = vld [vmem:[#allocation6] sm:$0xff]  ;;  %v912_v31 = vld [vmem:[#allocation6 + $0x8] sm:$0xff] }
 0x18b   :  { %v541_v20 = vadd.f32 %v540_v28, %v521_v13  ;;  %v535_v21 = vadd.f32 %v534_v53, %v533_v45  ;;  %1327 = vmatpush3.bf16.msra.mxu1 %v1326_v22  ;;  %v832_v13 = vld [vmem:[#allocation4 + $0x70] sm:$0xff]  ;;  %v920_v8 = vld [vmem:[#allocation6 + $0x48] sm:$0xff]  ;;  %v1038_v53 = vld [vmem:[%s2095_s6] ss:$0 sm:$0xff] }
 0x18c   :  { %v589_v56 = vadd.f32 %v588_v55, %v569_v17  ;;  %v582_v12 = vrot.slane %v581_v54, 1  ;;  %1328 = vmatprep.subr.bf16.mxu1 %v1489_v25  ;;  %v1344_v28 = vpack.c.bf16 %v833_v27, %v832_v13  ;;  %v914_v17 = vld [vmem:[#allocation6 + $0x18] sm:$0xff]  ;;  %v915_v55 = vld [vmem:[#allocation6 + $0x20] sm:$0xff]  ;;  %v921_v45 = vld [vmem:[#allocation6 + $0x50] sm:$0xff] }
 0x18d   :  { %v542_v60 = vadd.f32 %v541_v20, %v522_v40  ;;  %v913_v40 = vld [vmem:[#allocation6 + $0x10] sm:$0xff]  ;;  %v1347_v20 = vpack.c.bf16 %v912_v31, %v911_v44 }
 0x18e   :  { %v590_v0 = vadd.f32 %v589_v56, %v570_v61  ;;  %v583_v6 = vadd.f32 %v582_v12, %v581_v54  ;;  %v1350_v51 = vpack.c.bf16 %v914_v17, %v913_v40  ;;  %v918_v61 = vld [vmem:[#allocation6 + $0x38] sm:$0xff]  ;;  %v924_v54 = vld [vmem:[#allocation6 + $0x68] sm:$0xff] }
 0x18f   :  { %v543_v58 = vrot.slane %v542_v60, 4  ;;  %1330 = vmatpush3.bf16.msra.mxu1 %v1329_v62 }
 0x190   :  { %v591_v41 = vrot.slane %v590_v0, 4  ;;  %1331 = vmatprep.subr.bf16.mxu1 %v1489_v25 }
 0x191   :  { %v544_v29 = vadd.f32 %v543_v58, %v542_v60  ;;  %v1353_v60 = vpack.c.bf16 %v916_v49, %v915_v55  ;;  %v919_v58 = vld [vmem:[#allocation6 + $0x40] sm:$0xff] }
 0x192   :  { %v592_v3 = vadd.f32 %v591_v41, %v590_v0  ;;  %v1359_v0 = vpack.c.bf16 %v920_v8, %v919_v58 }
 0x193   :  { %v545_v2 = vrot.slane %v544_v29, 2  ;;  %1333 = vmatpush3.bf16.msra.mxu1 %v1332_v33 }
 0x194   :  { %v593_v35 = vrot.slane %v592_v3, 2  ;;  %1334 = vmatprep.subr.bf16.mxu1 %v1489_v25 }
 0x195   :  { %v546_v11 = vadd.f32 %v545_v2, %v544_v29  ;;  %v922_v29 = vld [vmem:[#allocation6 + $0x58] sm:$0xff]  ;;  %v923_v2 = vld [vmem:[#allocation6 + $0x60] sm:$0xff] }
 0x196   :  { %v594_v14 = vadd.f32 %v593_v35, %v592_v3  ;;  %v1362_v41 = vpack.c.bf16 %v922_v29, %v921_v45  ;;  %v1365_v3 = vpack.c.bf16 %v924_v54, %v923_v2 }
 0x197   :  { %v547_v63 = vrot.slane %v546_v11, 1  ;;  %1336 = vmatpush3.bf16.msra.mxu1 %v1335_v50 }
 0x198   :  { %v595_v38 = vrot.slane %v594_v14, 1  ;;  %1337 = vmatprep.subr.bf16.mxu1 %v1489_v25 }
 0x199   :  { %v548_v1 = vadd.f32 %v547_v63, %v546_v11 }
 0x19a   :  { %v596_v36 = vadd.f32 %v595_v38, %v594_v14  ;;  %v925_v14 = vld [vmem:[#allocation6 + $0x70] sm:$0xff]  ;;  %v1040_v38 = vld [vmem:[%s2097_s8] ss:$0 sm:$0xff] }
 0x19b   :  { %v552_v59 = vsel %vm551_vm5, %v548_v1, %v535_v21  ;;  %1339 = vmatpush3.bf16.msra.mxu1 %v1338_v23  ;;  %v926_v21 = vld [vmem:[#allocation6 + $0x78] sm:$0xff] }
 0x19c   :  { %554 = vst [vmem:[%s2100_s11] sm:$0x3] %v552_v59  ;;  %v599_v46 = vsel %vm551_vm5, %v596_v36, %v583_v6  ;;  %1340 = vmatprep.subr.bf16.mxu1 %v1489_v25  ;;  %v1368_v1 = vpack.c.bf16 %v926_v21, %v925_v14  ;;  %v1041_v36 = vld [vmem:[%s2099_s10] ss:$0 sm:$0xff] }
 0x19d   :  { %601 = vst [vmem:[%s2101_s12] sm:$0x3] %v599_v46 }
 0x19f   :  { %1342 = vmatpush3.bf16.msra.mxu1 %v1341_v26 }
 0x1a0   :  { %1343 = vmatprep.subr.bf16.mxu1 %v1489_v25 }
 0x1a3   :  { %1345 = vmatpush3.bf16.msra.mxu1 %v1344_v28 }
 0x221   :  { %v723_v19 = vpop.f32.mrb[0].mxu1 }
 0x222   :  { %v724_v42 = vadd.f32 %v1037_v5, %v723_v19  ;;  %v1188_v57 = vpop.f32.mrb[1].mxu1 }
 0x224   :  { %v727_v43 = vmax.f32 %v724_v42, 0.0 }
 0x226   :  { %1206 = vmatmul.mubr.msk.f32.vlgmr.msra.gmra.mrb[16].mxu0 %vm743_vm6, %v727_v43 }
 0x227   :  { %1275 = vmatprep.mubr.msk.f32.mxu0 %vm1490_vm1, %v1491_v47  ;;  %1348 = vmatpush3.bf16.msra.mxu0 %v1347_v20  ;;  %v917_v47 = vld [vmem:[#allocation6 + $0x30] sm:$0xff] }
 0x228   :  { %1349 = vmatprep.subr.bf16.mxu0 %v1489_v25  ;;  %v1356_v56 = vpack.c.bf16 %v918_v61, %v917_v47 }
 0x22b   :  { %1351 = vmatpush3.bf16.msra.mxu0 %v1350_v51 }
 0x22c   :  { %1352 = vmatprep.subr.bf16.mxu0 %v1489_v25 }
 0x22f   :  { %1354 = vmatpush3.bf16.msra.mxu0 %v1353_v60 }
 0x230   :  { %1355 = vmatprep.subr.bf16.mxu0 %v1489_v25 }
 0x233   :  { %1357 = vmatpush3.bf16.msra.mxu0 %v1356_v56 }
 0x234   :  { %1358 = vmatprep.subr.bf16.mxu0 %v1489_v25 }
 0x237   :  { %1360 = vmatpush3.bf16.msra.mxu0 %v1359_v0 }
 0x238   :  { %1361 = vmatprep.subr.bf16.mxu0 %v1489_v25 }
 0x23b   :  { %1363 = vmatpush3.bf16.msra.mxu0 %v1362_v41 }
 0x23c   :  { %1364 = vmatprep.subr.bf16.mxu0 %v1489_v25 }
 0x23f   :  { %1366 = vmatpush3.bf16.msra.mxu0 %v1365_v3 }
 0x240   :  { %1367 = vmatprep.subr.bf16.mxu0 %v1489_v25 }
 0x243   :  { %1369 = vmatpush3.bf16.msra.mxu0 %v1368_v1 }
 0x2f9   :  { %v813_v11 = vpop.f32.mrb[16].mxu0 }
 0x2fa   :  { %v814_v35 = vadd.f32 %v1038_v53, %v813_v11  ;;  %v1207_v63 = vpop.f32.mrb[17].mxu0 }
 0x2fc   :  { %v817_v12 = vmax.f32 %v814_v35, 0.0 }
 0x2fe   :  { %1241 = vmatmul.mubr.f32.vlgmr.msra.gmra.mrb[2].mxu1 %v817_v12 }
 0x3d1   :  { %v907_v59 = vpop.f32.mrb[2].mxu1 }
 0x3d2   :  { %v908_v6 = vadd.f32 %v1040_v38, %v907_v59  ;;  %v1242_v25 = vpop.f32.mrb[3].mxu1 }
 0x3d4   :  { %1276 = vmatmul.mubr.f32.vlgmr.msra.gmra.mrb[18].mxu0 %v908_v6 }
 0x4a7   :  { %v1000_v46 = vpop.f32.mrb[18].mxu0 }
 0x4a8   :  { %v1001_v30 = vadd.f32 %v1041_v36, %v1000_v46  ;;  %v1277_v24 = vpop.f32.mrb[19].mxu0 }
 0x4aa   :  { %v1004_v15 = vadd.f32 %v1001_v30, %v908_v6 }
 0x4ac   :  { %1005 = vst [vmem:[%s2102_s13] sm:$0x3] %v1004_v15 }
 0x4ad   :  { %1018 = vsyncpa [#allocation3], 1 }
 0x4ae   :  { %1019 = vsyncpa [#allocation5], 1 }

</bundles_post_ra>
